<compile_context>
chip_gen: v7x
topology: tpu7x:2x2x1
jax: 0.10.0
libtpu: 0.0.40
codegen_flags: <defaults>
</compile_context>

<pallas_src>
import math

import jax
import jax.numpy as jnp
from jax.experimental import pallas as pl
from jax.experimental.pallas import tpu as pltpu


def _round_up(n, m):
    return ((n + m - 1) // m) * m


def _linear_kernel(x_ref, w_ref, b_ref, o_ref):
    # x_ref: (TM, F)   w_ref: (F, TN)   b_ref: (1, TN)   o_ref: (TM, TN)
    acc = jnp.dot(x_ref[...], w_ref[...], preferred_element_type=jnp.float32)
    o_ref[...] = (acc + b_ref[...].astype(jnp.float32)).astype(o_ref.dtype)


def _vmem_capacity_bytes():
    """Physical VMEM per TensorCore; falls back to the smallest (v7x) figure."""
    try:
        return int(pltpu.get_tpu_info().vmem_capacity_bytes)
    except Exception:  # interpret mode / older jax: be conservative.
        return 64 * 1024 * 1024


def _resident_bytes(F, tn, itemsize):
    """VMEM footprint of weight+bias blocks, assuming Mosaic double-buffers them."""
    tn_pad = _round_up(tn, 128)
    w = _round_up(F, 8) * tn_pad * itemsize
    b = 8 * tn_pad * itemsize
    return 2 * (w + b)


def _choose_tiles(T, F, D, itemsize, vmem_limit):
    """Pick (TM, TN): TN keeps the resident weight <= ~40% of the VMEM limit
    (full D when possible); TM fills the rest with double-buffered x/out tiles."""
    slack = 2 * 1024 * 1024                       # headroom for internal scratch
    w_budget = (vmem_limit * 2) // 5

    if _resident_bytes(F, D, itemsize) <= w_budget:
        tn = D                                    # weight fully VMEM-resident
    else:
        tn = (w_budget // (2 * _round_up(F, 8) * itemsize)) // 128 * 128
        tn = max(128, tn)
        tn = min(tn, _round_up(D, 128))

    lane_f_bytes = _round_up(F, 128) * itemsize   # x lanes pad to 128 in VMEM
    lane_o_bytes = _round_up(tn, 128) * itemsize
    per_row = 2 * (lane_f_bytes + lane_o_bytes)   # 2x for double buffering

    avail = vmem_limit - slack - _resident_bytes(F, tn, itemsize)
    tm = max(8, (max(avail, 8 * per_row) // per_row) // 8 * 8)
    tm = min(tm, 8192)                            # keep per-step DMA latency sane
    tm = min(tm, _round_up(T, 8))
    return int(tm), int(tn)


def source_feature_embedder(x, weight_t, bias, *, tile_m=None, tile_n=None,
                            force_pallas=False):
    """Pallas equivalent of nn.Linear(feature_dim, d_model) forward.

    x:        (..., feature_dim)
    weight_t: (feature_dim, d_model)   -- pre-transposed once at init time
    bias:     (d_model,)
    returns   (..., d_model)
    """
    F = x.shape[-1]
    D = weight_t.shape[-1]
    lead_shape = x.shape[:-1]
    out_dtype = x.dtype
    itemsize = max(jnp.dtype(out_dtype).itemsize, jnp.dtype(weight_t.dtype).itemsize)

    x2d = x.reshape(-1, F)                        # token-major (T, F)
    T = x2d.shape[0]

    # ---- Small-problem fast path: single-step Pallas is pure fixed overhead.
    tiny = (T * F + T * D + F * D) * itemsize < 256 * 1024
    if tiny and not force_pallas:
        out2d = jnp.dot(x2d, weight_t, preferred_element_type=jnp.float32)
        out2d = (out2d + bias.astype(jnp.float32)).astype(out_dtype)
        return out2d.reshape(*lead_shape, D)

    # ---- VMEM budget per generation (128 MiB v5e/v6e, 64 MiB/TC v7x).
    cap = _vmem_capacity_bytes()
    vmem_limit = min(cap // 2, 64 * 1024 * 1024)

    TM, TN = _choose_tiles(T, F, D, itemsize, vmem_limit)
    if tile_m is not None:                        # validate user override
        TM = min(max(8, _round_up(int(tile_m), 8)), _round_up(T, 8))
    if tile_n is not None:
        TN = int(tile_n)
        if TN != D:
            TN = min(max(128, _round_up(TN, 128)), _round_up(D, 128))

    b2d = bias.reshape(1, D)

    # D axis outermost: if the weight had to be split (TN < D) it streams
    # exactly once while x is re-read D/TN times; when TN == D this is a
    # plain 1-D pipeline over tokens with a fully resident weight.
    grid = (pl.cdiv(D, TN), pl.cdiv(T, TM))

    cost = pl.CostEstimate(
        flops=2 * T * F * D,
        transcendentals=0,
        bytes_accessed=(T * F + F * D + D + T * D) * itemsize,
    )

    out2d = pl.pallas_call(
        _linear_kernel,
        out_shape=jax.ShapeDtypeStruct((T, D), out_dtype),
        grid_spec=pltpu.PrefetchScalarGridSpec(
            num_scalar_prefetch=0,
            grid=grid,
            in_specs=[
                pl.BlockSpec((TM, F), lambda j, i: (i, 0)),    # streamed x tiles
                pl.BlockSpec((F, TN), lambda j, i: (0, j)),    # resident per j
                pl.BlockSpec((1, TN), lambda j, i: (0, j)),    # resident per j
            ],
            out_specs=pl.BlockSpec((TM, TN), lambda j, i: (i, j)),
        ),
        compiler_params=pltpu.CompilerParams(
            dimension_semantics=("parallel", "parallel"),
            vmem_limit_bytes=int(vmem_limit),
        ),
        cost_estimate=cost,
    )(x2d, weight_t, b2d)

    return out2d.reshape(*lead_shape, D)


def init_params(key, feature_dim, d_model, dtype=jnp.float32):
    """nn.Linear-style init; weight returned ALREADY transposed to (F, D)."""
    k_w, k_b = jax.random.split(key)
    bound = 1.0 / math.sqrt(feature_dim)
    weight_t = jax.random.uniform(
        k_w, (feature_dim, d_model), dtype=dtype, minval=-bound, maxval=bound
    )
    bias = jax.random.uniform(
        k_b, (d_model,), dtype=dtype, minval=-bound, maxval=bound
    )
    return weight_t, bias


if __name__ == "__main__":
    key = jax.random.PRNGKey(0)
    k1, k2, k3, k4 = jax.random.split(key, 4)

    # Case 1: tiny demo shape -> XLA fast path (kernel deliberately skipped).
    batch, seq, feature_dim, d_model = 2, 8, 16, 32
    x_small = jax.random.normal(k1, (batch, seq, feature_dim), dtype=jnp.float32)
    w_small, b_small = init_params(k2, feature_dim, d_model)
    out_small = source_feature_embedder(x_small, w_small, b_small)
    jax.block_until_ready(out_small)
    ref_small = x_small @ w_small + b_small
    assert out_small.shape == (batch, seq, d_model), out_small.shape
    assert jnp.allclose(out_small, ref_small, atol=1e-5, rtol=1e-5), "fast-path mismatch"

    # Case 2: small but unaligned shape forced through the Pallas path
    # (T=387 rows, F=24, D=96 -> exercises partial row tile + masked lane store).
    batch, seq, feature_dim, d_model = 3, 129, 24, 96
    x = jax.random.normal(k3, (batch, seq, feature_dim), dtype=jnp.float32)
    w_t, b = init_params(k4, feature_dim, d_model)
    out = source_feature_embedder(x, w_t, b, force_pallas=True)
    jax.block_until_ready(out)
    ref = x @ w_t + b
    assert out.shape == (batch, seq, d_model), out.shape
    assert jnp.allclose(out, ref, atol=1e-4, rtol=1e-4), "pallas mismatch vs reference"

    print("KERNEL_OK")
</pallas_src>

<mosaic_0001>
module attributes {stable_mosaic.version = 11 : i64} {
  func.func @_linear_kernel(%arg0: i32, %arg1: i32, %arg2: memref<392x24xf32, #tpu.memory_space<vmem>>, %arg3: memref<24x96xf32, #tpu.memory_space<vmem>>, %arg4: memref<1x96xf32, #tpu.memory_space<vmem>>, %arg5: memref<392x96xf32, #tpu.memory_space<vmem>>) attributes {dimension_semantics = [#tpu.dimension_semantics<parallel>, #tpu.dimension_semantics<parallel>], iteration_bounds = array<i64: 1, 1>, scalar_prefetch = 0 : i64, scratch_operands = 0 : i64, tpu.core_type = #tpu.core_type<tc>, window_params = [{transform_indices = @transform_0, window_bounds = array<i64: 392, 24>}, {transform_indices = @transform_1, window_bounds = array<i64: 24, 96>}, {transform_indices = @transform_2, window_bounds = array<i64: 1, 96>}, {transform_indices = @transform_3, window_bounds = array<i64: 392, 96>}]} {
    %c0 = arith.constant 0 : index
    %c0_0 = arith.constant 0 : index
    %0 = vector.load %arg2[%c0, %c0_0] : memref<392x24xf32, #tpu.memory_space<vmem>>, vector<392x24xf32>
    %c0_1 = arith.constant 0 : index
    %c0_2 = arith.constant 0 : index
    %1 = vector.load %arg3[%c0_1, %c0_2] : memref<24x96xf32, #tpu.memory_space<vmem>>, vector<24x96xf32>
    %cst = arith.constant dense<0.000000e+00> : vector<392x96xf32>
    %2 = tpu.matmul %0, %1, %cst {dimension_numbers = #tpu.dot_dimension_numbers<[1], [0], [0], [1], [0, 0, 1, 1], [], []>} : vector<392x24xf32>, vector<24x96xf32>, vector<392x96xf32> -> vector<392x96xf32>
    %c0_3 = arith.constant 0 : index
    %c0_4 = arith.constant 0 : index
    %3 = vector.load %arg4[%c0_3, %c0_4] : memref<1x96xf32, #tpu.memory_space<vmem>>, vector<1x96xf32>
    %4 = vector.broadcast %3 : vector<1x96xf32> to vector<392x96xf32>
    %5 = arith.addf %2, %4 : vector<392x96xf32>
    %c0_5 = arith.constant 0 : index
    %c0_6 = arith.constant 0 : index
    %6 = vector.load %arg5[%c0_5, %c0_6] : memref<392x96xf32, #tpu.memory_space<vmem>>, vector<392x96xf32>
    tpu.vector_store %arg5[%c0_5, %c0_6], %5 {strides = array<i32>} : memref<392x96xf32, #tpu.memory_space<vmem>>, vector<392x96xf32>,
    return
  }
  func.func @transform_0(%arg0: i32, %arg1: i32) -> (i32, i32) {
    %c0_i32 = arith.constant 0 : i32
    %c0_i32_0 = arith.constant 0 : i32
    return %arg1, %c0_i32 : i32, i32
  }
  func.func @transform_1(%arg0: i32, %arg1: i32) -> (i32, i32) {
    %c0_i32 = arith.constant 0 : i32
    %c0_i32_0 = arith.constant 0 : i32
    return %c0_i32, %arg0 : i32, i32
  }
  func.func @transform_2(%arg0: i32, %arg1: i32) -> (i32, i32) {
    %c0_i32 = arith.constant 0 : i32
    %c0_i32_0 = arith.constant 0 : i32
    return %c0_i32, %arg0 : i32, i32
  }
  func.func @transform_3(%arg0: i32, %arg1: i32) -> (i32, i32) {
    %c0_i32 = arith.constant 0 : i32
    return %arg1, %arg0 : i32, i32
  }
}

</mosaic_0001>

<bundles_post_ra>
// kernel: tpu_custom_call.1
= control target key start
LH: loop header
LB: loop body
LE: loop exit
PB: predicated region body
PF: predicated region fallthrough
CT: control target
= control target key end

     0   :  { %v850_v0 = vmov 0.0|0.0   ;;  %vm851_vm0 = vmmov 0   ;;  %v852_v4 = vmov 0.0   ;;  %vm73_vm1 = vcmask 195584   ;;  %s1428_s1 = inlined_call_operand.vmem [shape: f32[24,96], index: 1, kind: input, shape index: {}]   ;;  %s1429_s0 = inlined_call_operand.vmem [shape: f32[387,24], index: 0, kind: input, shape index: {}]   ;;  %s1430_s2 = inlined_call_operand.vmem [shape: f32[1,96], index: 2, kind: input, shape index: {}]   ;;  %s1431_s3 = inlined_call_operand.vmem [shape: f32[387,96], index: 3, kind: output, shape index: {}]  }
   0x1   :  { %840 = vmatprep.subr.bf16.mxu0 %v850_v0  ;;  %v63_v1 = vld [vmem:[%s1428_s1] sm:$0xff]  ;;  %v64_v2 = vld [vmem:[%s1428_s1 + $0x8] sm:$0xff]  ;;  %843 = vmatprep.subr.bf16.mxu1 %v850_v0  ;;  %v65_v5 = vld [vmem:[%s1428_s1 + $0x10] sm:$0xff]  ;;  %vm531_vm2 = vcmask 785408  }
   0x2   :  { %v841_v3 = vpack.c.bf16 %v64_v2, %v63_v1  ;;  %693 = vmatprep.mubr.msk.f32.mxu0 %vm851_vm0, %v852_v4  ;;  %768 = vmatprep.mubr.msk.f32.mxu1 %vm851_vm0, %v852_v4  ;;  %v14_v6 = vld [vmem:[%s1429_s0] sm:$0xff]  ;;  %v39_v7 = vld [vmem:[%s1429_s0 + $0xc8] sm:$0xff]  ;;  %v40_v9 = vld [vmem:[%s1429_s0 + $0xd0] sm:$0xff] }
   0x3   :  { %v15_v8 = vld [vmem:[%s1429_s0 + $0x8] sm:$0xff]  ;;  %v16_v10 = vld [vmem:[%s1429_s0 + $0x10] sm:$0xff]  ;;  %v41_v11 = vld [vmem:[%s1429_s0 + $0xd8] sm:$0xff] }
   0x4   :  { %842 = vmatpush3.bf16.msra.mxu0 %v841_v3  ;;  %845 = vmatpush3.bf16.msra.mxu1 %v841_v3  ;;  %v17_v12 = vld [vmem:[%s1429_s0 + $0x18] sm:$0xff]  ;;  %v42_v13 = vld [vmem:[%s1429_s0 + $0xe0] sm:$0xff]  ;;  %v43_v15 = vld [vmem:[%s1429_s0 + $0xe8] sm:$0xff] }
   0x5   :  { %691 = vmatprep.subr.mxu0 %v852_v4  ;;  %844 = vmatprep.subr.mxu1 %v852_v4  ;;  %v18_v14 = vld [vmem:[%s1429_s0 + $0x20] sm:$0xff]  ;;  %v19_v16 = vld [vmem:[%s1429_s0 + $0x28] sm:$0xff]  ;;  %v44_v17 = vld [vmem:[%s1429_s0 + $0xf0] sm:$0xff] }
   0x6   :  { %v20_v18 = vld [vmem:[%s1429_s0 + $0x30] sm:$0xff]  ;;  %v45_v19 = vld [vmem:[%s1429_s0 + $0xf8] sm:$0xff]  ;;  %v46_v21 = vld [vmem:[%s1429_s0 + $0x100] sm:$0xff] }
   0x7   :  { %v21_v20 = vld [vmem:[%s1429_s0 + $0x38] sm:$0xff]  ;;  %v22_v22 = vld [vmem:[%s1429_s0 + $0x40] sm:$0xff]  ;;  %v47_v23 = vld [vmem:[%s1429_s0 + $0x108] sm:$0xff] }
   0x8   :  { %692 = vmatpush3.msra.mxu0 %v65_v5  ;;  %846 = vmatpush3.msra.mxu1 %v65_v5  ;;  %v23_v24 = vld [vmem:[%s1429_s0 + $0x48] sm:$0xff]  ;;  %v48_v25 = vld [vmem:[%s1429_s0 + $0x110] sm:$0xff]  ;;  %v49_v27 = vld [vmem:[%s1429_s0 + $0x118] sm:$0xff] }
   0x9   :  { %694 = vmatmul.mubr.msk.f32.vlgmr.msra.gmra.mrb[0].mxu0 %vm73_vm1, %v14_v6  ;;  %769 = vmatmul.mubr.msk.f32.vlgmr.msra.gmra.mrb[0].mxu1 %vm73_vm1, %v39_v7  ;;  %v24_v26 = vld [vmem:[%s1429_s0 + $0x50] sm:$0xff]  ;;  %v25_v28 = vld [vmem:[%s1429_s0 + $0x58] sm:$0xff]  ;;  %v50_v29 = vld [vmem:[%s1429_s0 + $0x120] sm:$0xff] }
   0xa   :  { %696 = vmatprep.mubr.msk.f32.mxu0 %vm851_vm0, %v852_v4  ;;  %771 = vmatprep.mubr.msk.f32.mxu1 %vm851_vm0, %v852_v4  ;;  %v26_v30 = vld [vmem:[%s1429_s0 + $0x60] sm:$0xff]  ;;  %v51_v31 = vld [vmem:[%s1429_s0 + $0x128] sm:$0xff]  ;;  %v52_v33 = vld [vmem:[%s1429_s0 + $0x130] sm:$0xff] }
   0xb   :  { %v27_v32 = vld [vmem:[%s1429_s0 + $0x68] sm:$0xff]  ;;  %v28_v34 = vld [vmem:[%s1429_s0 + $0x70] sm:$0xff]  ;;  %v53_v35 = vld [vmem:[%s1429_s0 + $0x138] sm:$0xff] }
   0xc   :  { %v29_v36 = vld [vmem:[%s1429_s0 + $0x78] sm:$0xff]  ;;  %v54_v37 = vld [vmem:[%s1429_s0 + $0x140] sm:$0xff]  ;;  %v55_v39 = vld [vmem:[%s1429_s0 + $0x148] sm:$0xff] }
   0xd   :  { %697 = vmatmul.mubr.msk.f32.gmra.mrb[2].mxu0 %vm73_vm1, %v15_v8  ;;  %772 = vmatmul.mubr.msk.f32.gmra.mrb[2].mxu1 %vm73_vm1, %v40_v9  ;;  %v30_v38 = vld [vmem:[%s1429_s0 + $0x80] sm:$0xff]  ;;  %v31_v40 = vld [vmem:[%s1429_s0 + $0x88] sm:$0xff]  ;;  %v56_v41 = vld [vmem:[%s1429_s0 + $0x150] sm:$0xff] }
   0xe   :  { %699 = vmatprep.mubr.msk.f32.mxu0 %vm851_vm0, %v852_v4  ;;  %774 = vmatprep.mubr.msk.f32.mxu1 %vm851_vm0, %v852_v4  ;;  %v32_v42 = vld [vmem:[%s1429_s0 + $0x90] sm:$0xff]  ;;  %v57_v43 = vld [vmem:[%s1429_s0 + $0x158] sm:$0xff]  ;;  %v58_v45 = vld [vmem:[%s1429_s0 + $0x160] sm:$0xff] }
   0xf   :  { %v33_v44 = vld [vmem:[%s1429_s0 + $0x98] sm:$0xff]  ;;  %v34_v46 = vld [vmem:[%s1429_s0 + $0xa0] sm:$0xff]  ;;  %v59_v47 = vld [vmem:[%s1429_s0 + $0x168] sm:$0xff] }
  0x10   :  { %v35_v48 = vld [vmem:[%s1429_s0 + $0xa8] sm:$0xff]  ;;  %v60_v49 = vld [vmem:[%s1429_s0 + $0x170] sm:$0xff]  ;;  %v61_v51 = vld [vmem:[%s1429_s0 + $0x178] sm:$0xff] }
  0x11   :  { %700 = vmatmul.mubr.msk.f32.gmra.mrb[4].mxu0 %vm73_vm1, %v16_v10  ;;  %775 = vmatmul.mubr.msk.f32.gmra.mrb[4].mxu1 %vm73_vm1, %v41_v11  ;;  %v36_v50 = vld [vmem:[%s1429_s0 + $0xb0] sm:$0xff]  ;;  %v37_v52 = vld [vmem:[%s1429_s0 + $0xb8] sm:$0xff]  ;;  %v62_v53 = vld [vmem:[%s1429_s0 + $0x180] sm:$0xff] }
  0x12   :  { %702 = vmatprep.mubr.msk.f32.mxu0 %vm851_vm0, %v852_v4  ;;  %777 = vmatprep.mubr.msk.f32.mxu1 %vm851_vm0, %v852_v4  ;;  %v38_v54 = vld [vmem:[%s1429_s0 + $0xc0] sm:$0xff] }
  0x13   :  { %v1181_v55 = vld [vmem:[%s1430_s2] ss:$0 sm:$0xff] }
  0x15   :  { %703 = vmatmul.mubr.msk.f32.gmra.mrb[6].mxu0 %vm73_vm1, %v17_v12  ;;  %778 = vmatmul.mubr.msk.f32.gmra.mrb[6].mxu1 %vm73_vm1, %v42_v13 }
  0x16   :  { %705 = vmatprep.mubr.msk.f32.mxu0 %vm851_vm0, %v852_v4  ;;  %780 = vmatprep.mubr.msk.f32.mxu1 %vm851_vm0, %v852_v4 }
  0x19   :  { %706 = vmatmul.mubr.msk.f32.gmra.mrb[8].mxu0 %vm73_vm1, %v18_v14  ;;  %781 = vmatmul.mubr.msk.f32.gmra.mrb[8].mxu1 %vm73_vm1, %v43_v15 }
  0x1a   :  { %708 = vmatprep.mubr.msk.f32.mxu0 %vm851_vm0, %v852_v4  ;;  %783 = vmatprep.mubr.msk.f32.mxu1 %vm851_vm0, %v852_v4 }
  0x1d   :  { %709 = vmatmul.mubr.msk.f32.gmra.mrb[10].mxu0 %vm73_vm1, %v19_v16  ;;  %784 = vmatmul.mubr.msk.f32.gmra.mrb[10].mxu1 %vm73_vm1, %v44_v17 }
  0x1e   :  { %711 = vmatprep.mubr.msk.f32.mxu0 %vm851_vm0, %v852_v4  ;;  %786 = vmatprep.mubr.msk.f32.mxu1 %vm851_vm0, %v852_v4 }
  0x21   :  { %712 = vmatmul.mubr.msk.f32.gmra.mrb[12].mxu0 %vm73_vm1, %v20_v18  ;;  %787 = vmatmul.mubr.msk.f32.gmra.mrb[12].mxu1 %vm73_vm1, %v45_v19 }
  0x22   :  { %714 = vmatprep.mubr.msk.f32.mxu0 %vm851_vm0, %v852_v4  ;;  %789 = vmatprep.mubr.msk.f32.mxu1 %vm851_vm0, %v852_v4 }
  0x25   :  { %715 = vmatmul.mubr.msk.f32.gmra.mrb[14].mxu0 %vm73_vm1, %v21_v20  ;;  %790 = vmatmul.mubr.msk.f32.gmra.mrb[14].mxu1 %vm73_vm1, %v46_v21 }
  0x26   :  { %717 = vmatprep.mubr.msk.f32.mxu0 %vm851_vm0, %v852_v4  ;;  %792 = vmatprep.mubr.msk.f32.mxu1 %vm851_vm0, %v852_v4 }
  0x29   :  { %718 = vmatmul.mubr.msk.f32.gmra.mrb[16].mxu0 %vm73_vm1, %v22_v22  ;;  %793 = vmatmul.mubr.msk.f32.gmra.mrb[16].mxu1 %vm73_vm1, %v47_v23 }
  0x2a   :  { %720 = vmatprep.mubr.msk.f32.mxu0 %vm851_vm0, %v852_v4  ;;  %795 = vmatprep.mubr.msk.f32.mxu1 %vm851_vm0, %v852_v4 }
  0x2d   :  { %721 = vmatmul.mubr.msk.f32.gmra.mrb[18].mxu0 %vm73_vm1, %v23_v24  ;;  %796 = vmatmul.mubr.msk.f32.gmra.mrb[18].mxu1 %vm73_vm1, %v48_v25 }
  0x2e   :  { %723 = vmatprep.mubr.msk.f32.mxu0 %vm851_vm0, %v852_v4  ;;  %798 = vmatprep.mubr.msk.f32.mxu1 %vm851_vm0, %v852_v4 }
  0x31   :  { %724 = vmatmul.mubr.msk.f32.gmra.mrb[20].mxu0 %vm73_vm1, %v24_v26  ;;  %799 = vmatmul.mubr.msk.f32.gmra.mrb[20].mxu1 %vm73_vm1, %v49_v27 }
  0x32   :  { %726 = vmatprep.mubr.msk.f32.mxu0 %vm851_vm0, %v852_v4  ;;  %801 = vmatprep.mubr.msk.f32.mxu1 %vm851_vm0, %v852_v4 }
  0x35   :  { %727 = vmatmul.mubr.msk.f32.gmra.mrb[22].mxu0 %vm73_vm1, %v25_v28  ;;  %802 = vmatmul.mubr.msk.f32.gmra.mrb[22].mxu1 %vm73_vm1, %v50_v29 }
  0x36   :  { %729 = vmatprep.mubr.msk.f32.mxu0 %vm851_vm0, %v852_v4  ;;  %804 = vmatprep.mubr.msk.f32.mxu1 %vm851_vm0, %v852_v4 }
  0x39   :  { %730 = vmatmul.mubr.msk.f32.gmra.mrb[24].mxu0 %vm73_vm1, %v26_v30  ;;  %805 = vmatmul.mubr.msk.f32.gmra.mrb[24].mxu1 %vm73_vm1, %v51_v31 }
  0x3a   :  { %732 = vmatprep.mubr.msk.f32.mxu0 %vm851_vm0, %v852_v4  ;;  %807 = vmatprep.mubr.msk.f32.mxu1 %vm851_vm0, %v852_v4 }
  0x3d   :  { %733 = vmatmul.mubr.msk.f32.gmra.mrb[26].mxu0 %vm73_vm1, %v27_v32  ;;  %808 = vmatmul.mubr.msk.f32.gmra.mrb[26].mxu1 %vm73_vm1, %v52_v33 }
  0x3e   :  { %735 = vmatprep.mubr.msk.f32.mxu0 %vm851_vm0, %v852_v4  ;;  %810 = vmatprep.mubr.msk.f32.mxu1 %vm851_vm0, %v852_v4 }
  0x41   :  { %736 = vmatmul.mubr.msk.f32.gmra.mrb[28].mxu0 %vm73_vm1, %v28_v34  ;;  %811 = vmatmul.mubr.msk.f32.gmra.mrb[28].mxu1 %vm73_vm1, %v53_v35 }
  0x42   :  { %738 = vmatprep.mubr.msk.f32.mxu0 %vm851_vm0, %v852_v4  ;;  %813 = vmatprep.mubr.msk.f32.mxu1 %vm851_vm0, %v852_v4 }
  0x45   :  { %739 = vmatmul.mubr.msk.f32.gmra.mrb[30].mxu0 %vm73_vm1, %v29_v36  ;;  %814 = vmatmul.mubr.msk.f32.gmra.mrb[30].mxu1 %vm73_vm1, %v54_v37 }
  0x46   :  { %741 = vmatprep.mubr.msk.f32.mxu0 %vm851_vm0, %v852_v4  ;;  %816 = vmatprep.mubr.msk.f32.mxu1 %vm851_vm0, %v852_v4 }
  0x49   :  { %742 = vmatmul.mubr.msk.f32.gmra.mrb[32].mxu0 %vm73_vm1, %v30_v38  ;;  %817 = vmatmul.mubr.msk.f32.gmra.mrb[32].mxu1 %vm73_vm1, %v55_v39 }
  0x4a   :  { %744 = vmatprep.mubr.msk.f32.mxu0 %vm851_vm0, %v852_v4  ;;  %819 = vmatprep.mubr.msk.f32.mxu1 %vm851_vm0, %v852_v4 }
  0x4d   :  { %745 = vmatmul.mubr.msk.f32.gmra.mrb[34].mxu0 %vm73_vm1, %v31_v40  ;;  %820 = vmatmul.mubr.msk.f32.gmra.mrb[34].mxu1 %vm73_vm1, %v56_v41 }
  0x4e   :  { %747 = vmatprep.mubr.msk.f32.mxu0 %vm851_vm0, %v852_v4  ;;  %822 = vmatprep.mubr.msk.f32.mxu1 %vm851_vm0, %v852_v4 }
  0x51   :  { %748 = vmatmul.mubr.msk.f32.gmra.mrb[36].mxu0 %vm73_vm1, %v32_v42  ;;  %823 = vmatmul.mubr.msk.f32.gmra.mrb[36].mxu1 %vm73_vm1, %v57_v43 }
  0x52   :  { %750 = vmatprep.mubr.msk.f32.mxu0 %vm851_vm0, %v852_v4  ;;  %825 = vmatprep.mubr.msk.f32.mxu1 %vm851_vm0, %v852_v4 }
  0x55   :  { %751 = vmatmul.mubr.msk.f32.gmra.mrb[38].mxu0 %vm73_vm1, %v33_v44  ;;  %826 = vmatmul.mubr.msk.f32.gmra.mrb[38].mxu1 %vm73_vm1, %v58_v45 }
  0x56   :  { %753 = vmatprep.mubr.msk.f32.mxu0 %vm851_vm0, %v852_v4  ;;  %828 = vmatprep.mubr.msk.f32.mxu1 %vm851_vm0, %v852_v4 }
  0x59   :  { %754 = vmatmul.mubr.msk.f32.gmra.mrb[40].mxu0 %vm73_vm1, %v34_v46  ;;  %829 = vmatmul.mubr.msk.f32.gmra.mrb[40].mxu1 %vm73_vm1, %v59_v47 }
  0x5a   :  { %756 = vmatprep.mubr.msk.f32.mxu0 %vm851_vm0, %v852_v4  ;;  %831 = vmatprep.mubr.msk.f32.mxu1 %vm851_vm0, %v852_v4 }
  0x5d   :  { %757 = vmatmul.mubr.msk.f32.gmra.mrb[42].mxu0 %vm73_vm1, %v35_v48  ;;  %832 = vmatmul.mubr.msk.f32.gmra.mrb[42].mxu1 %vm73_vm1, %v60_v49 }
  0x5e   :  { %759 = vmatprep.mubr.msk.f32.mxu0 %vm851_vm0, %v852_v4  ;;  %834 = vmatprep.mubr.msk.f32.mxu1 %vm851_vm0, %v852_v4 }
  0x61   :  { %760 = vmatmul.mubr.msk.f32.gmra.mrb[44].mxu0 %vm73_vm1, %v36_v50  ;;  %835 = vmatmul.mubr.msk.f32.gmra.mrb[44].mxu1 %vm73_vm1, %v61_v51 }
  0x62   :  { %762 = vmatprep.mubr.msk.f32.mxu0 %vm851_vm0, %v852_v4  ;;  %837 = vmatprep.mubr.msk.f32.mxu1 %vm851_vm0, %v852_v4 }
  0x65   :  { %763 = vmatmul.mubr.msk.f32.gmra.mrb[46].mxu0 %vm73_vm1, %v37_v52  ;;  %838 = vmatmul.mubr.msk.f32.gmra.mrb[46].mxu1 %vm73_vm1, %v62_v53 }
  0x66   :  { %765 = vmatprep.mubr.msk.f32.mxu0 %vm851_vm0, %v852_v4 }
  0x69   :  { %766 = vmatmul.mubr.msk.f32.gmra.mrb[48].mxu0 %vm73_vm1, %v38_v54 }
  0xdc   :  { %v287_v56 = vpop.f32.mrb[0].mxu0  ;;  %v412_v57 = vpop.f32.mrb[0].mxu1 }
  0xdd   :  { %v288_v58 = vadd.f32 %v1181_v55, %v287_v56  ;;  %v695_v59 = vpop.f32.mrb[1].mxu0  ;;  %v413_v60 = vadd.f32 %v1181_v55, %v412_v57  ;;  %v770_v61 = vpop.f32.mrb[1].mxu1 }
  0xdf   :  { %532 = vst.msk [vmem:[%s1431_s3] sm:$0xff] %vm531_vm2, %v288_v58  ;;  %557 = vst.msk [vmem:[%s1431_s3 + $0xc8] sm:$0xff] %vm531_vm2, %v413_v60 }
  0xe0   :  { %v292_v62 = vpop.f32.mrb[2].mxu0  ;;  %v417_v63 = vpop.f32.mrb[2].mxu1 }
  0xe1   :  { %v293_v0 = vadd.f32 %v1181_v55, %v292_v62  ;;  %v698_v1 = vpop.f32.mrb[3].mxu0  ;;  %v418_v2 = vadd.f32 %v1181_v55, %v417_v63  ;;  %v773_v3 = vpop.f32.mrb[3].mxu1 }
  0xe3   :  { %533 = vst.msk [vmem:[%s1431_s3 + $0x8] sm:$0xff] %vm531_vm2, %v293_v0  ;;  %558 = vst.msk [vmem:[%s1431_s3 + $0xd0] sm:$0xff] %vm531_vm2, %v418_v2 }
  0xe4   :  { %v297_v4 = vpop.f32.mrb[4].mxu0  ;;  %v422_v5 = vpop.f32.mrb[4].mxu1 }
  0xe5   :  { %v298_v6 = vadd.f32 %v1181_v55, %v297_v4  ;;  %v701_v7 = vpop.f32.mrb[5].mxu0  ;;  %v423_v8 = vadd.f32 %v1181_v55, %v422_v5  ;;  %v776_v9 = vpop.f32.mrb[5].mxu1 }
  0xe7   :  { %534 = vst.msk [vmem:[%s1431_s3 + $0x10] sm:$0xff] %vm531_vm2, %v298_v6  ;;  %559 = vst.msk [vmem:[%s1431_s3 + $0xd8] sm:$0xff] %vm531_vm2, %v423_v8 }
  0xe8   :  { %v302_v10 = vpop.f32.mrb[6].mxu0  ;;  %v427_v11 = vpop.f32.mrb[6].mxu1 }
  0xe9   :  { %v303_v12 = vadd.f32 %v1181_v55, %v302_v10  ;;  %v704_v13 = vpop.f32.mrb[7].mxu0  ;;  %v428_v14 = vadd.f32 %v1181_v55, %v427_v11  ;;  %v779_v15 = vpop.f32.mrb[7].mxu1 }
  0xeb   :  { %535 = vst.msk [vmem:[%s1431_s3 + $0x18] sm:$0xff] %vm531_vm2, %v303_v12  ;;  %560 = vst.msk [vmem:[%s1431_s3 + $0xe0] sm:$0xff] %vm531_vm2, %v428_v14 }
  0xec   :  { %v307_v16 = vpop.f32.mrb[8].mxu0  ;;  %v432_v17 = vpop.f32.mrb[8].mxu1 }
  0xed   :  { %v308_v18 = vadd.f32 %v1181_v55, %v307_v16  ;;  %v707_v19 = vpop.f32.mrb[9].mxu0  ;;  %v433_v20 = vadd.f32 %v1181_v55, %v432_v17  ;;  %v782_v21 = vpop.f32.mrb[9].mxu1 }
  0xef   :  { %536 = vst.msk [vmem:[%s1431_s3 + $0x20] sm:$0xff] %vm531_vm2, %v308_v18  ;;  %561 = vst.msk [vmem:[%s1431_s3 + $0xe8] sm:$0xff] %vm531_vm2, %v433_v20 }
  0xf0   :  { %v312_v22 = vpop.f32.mrb[10].mxu0  ;;  %v437_v23 = vpop.f32.mrb[10].mxu1 }
  0xf1   :  { %v313_v24 = vadd.f32 %v1181_v55, %v312_v22  ;;  %v710_v25 = vpop.f32.mrb[11].mxu0  ;;  %v438_v26 = vadd.f32 %v1181_v55, %v437_v23  ;;  %v785_v27 = vpop.f32.mrb[11].mxu1 }
  0xf3   :  { %537 = vst.msk [vmem:[%s1431_s3 + $0x28] sm:$0xff] %vm531_vm2, %v313_v24  ;;  %562 = vst.msk [vmem:[%s1431_s3 + $0xf0] sm:$0xff] %vm531_vm2, %v438_v26 }
  0xf4   :  { %v317_v28 = vpop.f32.mrb[12].mxu0  ;;  %v442_v29 = vpop.f32.mrb[12].mxu1 }
  0xf5   :  { %v318_v30 = vadd.f32 %v1181_v55, %v317_v28  ;;  %v713_v31 = vpop.f32.mrb[13].mxu0  ;;  %v443_v32 = vadd.f32 %v1181_v55, %v442_v29  ;;  %v788_v33 = vpop.f32.mrb[13].mxu1 }
  0xf7   :  { %538 = vst.msk [vmem:[%s1431_s3 + $0x30] sm:$0xff] %vm531_vm2, %v318_v30  ;;  %563 = vst.msk [vmem:[%s1431_s3 + $0xf8] sm:$0xff] %vm531_vm2, %v443_v32 }
  0xf8   :  { %v322_v34 = vpop.f32.mrb[14].mxu0  ;;  %v447_v35 = vpop.f32.mrb[14].mxu1 }
  0xf9   :  { %v323_v36 = vadd.f32 %v1181_v55, %v322_v34  ;;  %v716_v37 = vpop.f32.mrb[15].mxu0  ;;  %v448_v38 = vadd.f32 %v1181_v55, %v447_v35  ;;  %v791_v39 = vpop.f32.mrb[15].mxu1 }
  0xfb   :  { %539 = vst.msk [vmem:[%s1431_s3 + $0x38] sm:$0xff] %vm531_vm2, %v323_v36  ;;  %564 = vst.msk [vmem:[%s1431_s3 + $0x100] sm:$0xff] %vm531_vm2, %v448_v38 }
  0xfc   :  { %v327_v40 = vpop.f32.mrb[16].mxu0  ;;  %v452_v41 = vpop.f32.mrb[16].mxu1 }
  0xfd   :  { %v328_v42 = vadd.f32 %v1181_v55, %v327_v40  ;;  %v719_v43 = vpop.f32.mrb[17].mxu0  ;;  %v453_v44 = vadd.f32 %v1181_v55, %v452_v41  ;;  %v794_v45 = vpop.f32.mrb[17].mxu1 }
  0xff   :  { %540 = vst.msk [vmem:[%s1431_s3 + $0x40] sm:$0xff] %vm531_vm2, %v328_v42  ;;  %565 = vst.msk [vmem:[%s1431_s3 + $0x108] sm:$0xff] %vm531_vm2, %v453_v44 }
 0x100   :  { %v332_v46 = vpop.f32.mrb[18].mxu0  ;;  %v457_v47 = vpop.f32.mrb[18].mxu1 }
 0x101   :  { %v333_v48 = vadd.f32 %v1181_v55, %v332_v46  ;;  %v722_v49 = vpop.f32.mrb[19].mxu0  ;;  %v458_v50 = vadd.f32 %v1181_v55, %v457_v47  ;;  %v797_v51 = vpop.f32.mrb[19].mxu1 }
 0x103   :  { %541 = vst.msk [vmem:[%s1431_s3 + $0x48] sm:$0xff] %vm531_vm2, %v333_v48  ;;  %566 = vst.msk [vmem:[%s1431_s3 + $0x110] sm:$0xff] %vm531_vm2, %v458_v50 }
 0x104   :  { %v337_v52 = vpop.f32.mrb[20].mxu0  ;;  %v462_v53 = vpop.f32.mrb[20].mxu1 }
 0x105   :  { %v338_v54 = vadd.f32 %v1181_v55, %v337_v52  ;;  %v725_v56 = vpop.f32.mrb[21].mxu0  ;;  %v463_v57 = vadd.f32 %v1181_v55, %v462_v53  ;;  %v800_v58 = vpop.f32.mrb[21].mxu1 }
 0x107   :  { %542 = vst.msk [vmem:[%s1431_s3 + $0x50] sm:$0xff] %vm531_vm2, %v338_v54  ;;  %567 = vst.msk [vmem:[%s1431_s3 + $0x118] sm:$0xff] %vm531_vm2, %v463_v57 }
 0x108   :  { %v342_v59 = vpop.f32.mrb[22].mxu0  ;;  %v467_v60 = vpop.f32.mrb[22].mxu1 }
 0x109   :  { %v343_v61 = vadd.f32 %v1181_v55, %v342_v59  ;;  %v728_v62 = vpop.f32.mrb[23].mxu0  ;;  %v468_v63 = vadd.f32 %v1181_v55, %v467_v60  ;;  %v803_v0 = vpop.f32.mrb[23].mxu1 }
 0x10b   :  { %543 = vst.msk [vmem:[%s1431_s3 + $0x58] sm:$0xff] %vm531_vm2, %v343_v61  ;;  %568 = vst.msk [vmem:[%s1431_s3 + $0x120] sm:$0xff] %vm531_vm2, %v468_v63 }
 0x10c   :  { %v347_v1 = vpop.f32.mrb[24].mxu0  ;;  %v472_v2 = vpop.f32.mrb[24].mxu1 }
 0x10d   :  { %v348_v3 = vadd.f32 %v1181_v55, %v347_v1  ;;  %v731_v4 = vpop.f32.mrb[25].mxu0  ;;  %v473_v5 = vadd.f32 %v1181_v55, %v472_v2  ;;  %v806_v6 = vpop.f32.mrb[25].mxu1 }
 0x10f   :  { %544 = vst.msk [vmem:[%s1431_s3 + $0x60] sm:$0xff] %vm531_vm2, %v348_v3  ;;  %569 = vst.msk [vmem:[%s1431_s3 + $0x128] sm:$0xff] %vm531_vm2, %v473_v5 }
 0x110   :  { %v352_v7 = vpop.f32.mrb[26].mxu0  ;;  %v477_v8 = vpop.f32.mrb[26].mxu1 }
 0x111   :  { %v353_v9 = vadd.f32 %v1181_v55, %v352_v7  ;;  %v734_v10 = vpop.f32.mrb[27].mxu0  ;;  %v478_v11 = vadd.f32 %v1181_v55, %v477_v8  ;;  %v809_v12 = vpop.f32.mrb[27].mxu1 }
 0x113   :  { %545 = vst.msk [vmem:[%s1431_s3 + $0x68] sm:$0xff] %vm531_vm2, %v353_v9  ;;  %570 = vst.msk [vmem:[%s1431_s3 + $0x130] sm:$0xff] %vm531_vm2, %v478_v11 }
 0x114   :  { %v357_v13 = vpop.f32.mrb[28].mxu0  ;;  %v482_v14 = vpop.f32.mrb[28].mxu1 }
 0x115   :  { %v358_v15 = vadd.f32 %v1181_v55, %v357_v13  ;;  %v737_v16 = vpop.f32.mrb[29].mxu0  ;;  %v483_v17 = vadd.f32 %v1181_v55, %v482_v14  ;;  %v812_v18 = vpop.f32.mrb[29].mxu1 }
 0x117   :  { %546 = vst.msk [vmem:[%s1431_s3 + $0x70] sm:$0xff] %vm531_vm2, %v358_v15  ;;  %571 = vst.msk [vmem:[%s1431_s3 + $0x138] sm:$0xff] %vm531_vm2, %v483_v17 }
 0x118   :  { %v362_v19 = vpop.f32.mrb[30].mxu0  ;;  %v487_v20 = vpop.f32.mrb[30].mxu1 }
 0x119   :  { %v363_v21 = vadd.f32 %v1181_v55, %v362_v19  ;;  %v740_v22 = vpop.f32.mrb[31].mxu0  ;;  %v488_v23 = vadd.f32 %v1181_v55, %v487_v20  ;;  %v815_v24 = vpop.f32.mrb[31].mxu1 }
 0x11b   :  { %547 = vst.msk [vmem:[%s1431_s3 + $0x78] sm:$0xff] %vm531_vm2, %v363_v21  ;;  %572 = vst.msk [vmem:[%s1431_s3 + $0x140] sm:$0xff] %vm531_vm2, %v488_v23 }
 0x11c   :  { %v367_v25 = vpop.f32.mrb[32].mxu0  ;;  %v492_v26 = vpop.f32.mrb[32].mxu1 }
 0x11d   :  { %v368_v27 = vadd.f32 %v1181_v55, %v367_v25  ;;  %v743_v28 = vpop.f32.mrb[33].mxu0  ;;  %v493_v29 = vadd.f32 %v1181_v55, %v492_v26  ;;  %v818_v30 = vpop.f32.mrb[33].mxu1 }
 0x11f   :  { %548 = vst.msk [vmem:[%s1431_s3 + $0x80] sm:$0xff] %vm531_vm2, %v368_v27  ;;  %573 = vst.msk [vmem:[%s1431_s3 + $0x148] sm:$0xff] %vm531_vm2, %v493_v29 }
 0x120   :  { %v372_v31 = vpop.f32.mrb[34].mxu0  ;;  %v497_v32 = vpop.f32.mrb[34].mxu1 }
 0x121   :  { %v373_v33 = vadd.f32 %v1181_v55, %v372_v31  ;;  %v746_v34 = vpop.f32.mrb[35].mxu0  ;;  %v498_v35 = vadd.f32 %v1181_v55, %v497_v32  ;;  %v821_v36 = vpop.f32.mrb[35].mxu1 }
 0x123   :  { %549 = vst.msk [vmem:[%s1431_s3 + $0x88] sm:$0xff] %vm531_vm2, %v373_v33  ;;  %574 = vst.msk [vmem:[%s1431_s3 + $0x150] sm:$0xff] %vm531_vm2, %v498_v35 }
 0x124   :  { %v377_v37 = vpop.f32.mrb[36].mxu0  ;;  %v502_v38 = vpop.f32.mrb[36].mxu1 }
 0x125   :  { %v378_v39 = vadd.f32 %v1181_v55, %v377_v37  ;;  %v749_v40 = vpop.f32.mrb[37].mxu0  ;;  %v503_v41 = vadd.f32 %v1181_v55, %v502_v38  ;;  %v824_v42 = vpop.f32.mrb[37].mxu1 }
 0x127   :  { %550 = vst.msk [vmem:[%s1431_s3 + $0x90] sm:$0xff] %vm531_vm2, %v378_v39  ;;  %575 = vst.msk [vmem:[%s1431_s3 + $0x158] sm:$0xff] %vm531_vm2, %v503_v41 }
 0x128   :  { %v382_v43 = vpop.f32.mrb[38].mxu0  ;;  %v507_v44 = vpop.f32.mrb[38].mxu1 }
 0x129   :  { %v383_v45 = vadd.f32 %v1181_v55, %v382_v43  ;;  %v752_v46 = vpop.f32.mrb[39].mxu0  ;;  %v508_v47 = vadd.f32 %v1181_v55, %v507_v44  ;;  %v827_v48 = vpop.f32.mrb[39].mxu1 }
 0x12b   :  { %551 = vst.msk [vmem:[%s1431_s3 + $0x98] sm:$0xff] %vm531_vm2, %v383_v45  ;;  %576 = vst.msk [vmem:[%s1431_s3 + $0x160] sm:$0xff] %vm531_vm2, %v508_v47 }
 0x12c   :  { %v387_v49 = vpop.f32.mrb[40].mxu0  ;;  %v512_v50 = vpop.f32.mrb[40].mxu1 }
 0x12d   :  { %v388_v51 = vadd.f32 %v1181_v55, %v387_v49  ;;  %v755_v52 = vpop.f32.mrb[41].mxu0  ;;  %v513_v53 = vadd.f32 %v1181_v55, %v512_v50  ;;  %v830_v54 = vpop.f32.mrb[41].mxu1 }
 0x12f   :  { %552 = vst.msk [vmem:[%s1431_s3 + $0xa0] sm:$0xff] %vm531_vm2, %v388_v51  ;;  %577 = vst.msk [vmem:[%s1431_s3 + $0x168] sm:$0xff] %vm531_vm2, %v513_v53 }
 0x130   :  { %v392_v56 = vpop.f32.mrb[42].mxu0  ;;  %v517_v57 = vpop.f32.mrb[42].mxu1 }
 0x131   :  { %v393_v58 = vadd.f32 %v1181_v55, %v392_v56  ;;  %v758_v59 = vpop.f32.mrb[43].mxu0  ;;  %v518_v60 = vadd.f32 %v1181_v55, %v517_v57  ;;  %v833_v61 = vpop.f32.mrb[43].mxu1 }
 0x133   :  { %553 = vst.msk [vmem:[%s1431_s3 + $0xa8] sm:$0xff] %vm531_vm2, %v393_v58  ;;  %578 = vst.msk [vmem:[%s1431_s3 + $0x170] sm:$0xff] %vm531_vm2, %v518_v60 }
 0x134   :  { %v397_v62 = vpop.f32.mrb[44].mxu0  ;;  %v522_v63 = vpop.f32.mrb[44].mxu1 }
 0x135   :  { %v398_v0 = vadd.f32 %v1181_v55, %v397_v62  ;;  %v761_v1 = vpop.f32.mrb[45].mxu0  ;;  %v523_v2 = vadd.f32 %v1181_v55, %v522_v63  ;;  %v836_v3 = vpop.f32.mrb[45].mxu1 }
 0x137   :  { %554 = vst.msk [vmem:[%s1431_s3 + $0xb0] sm:$0xff] %vm531_vm2, %v398_v0  ;;  %579 = vst.msk [vmem:[%s1431_s3 + $0x178] sm:$0xff] %vm531_vm2, %v523_v2 }
 0x138   :  { %v402_v4 = vpop.f32.mrb[46].mxu0  ;;  %v527_v5 = vpop.f32.mrb[46].mxu1 }
 0x139   :  { %v403_v6 = vadd.f32 %v1181_v55, %v402_v4  ;;  %v764_v7 = vpop.f32.mrb[47].mxu0  ;;  %v528_v8 = vadd.f32 %v1181_v55, %v527_v5  ;;  %v839_v9 = vpop.f32.mrb[47].mxu1 }
 0x13b   :  { %555 = vst.msk [vmem:[%s1431_s3 + $0xb8] sm:$0xff] %vm531_vm2, %v403_v6  ;;  %580 = vst.msk [vmem:[%s1431_s3 + $0x180] sm:$0xff] %vm531_vm2, %v528_v8 }
 0x13c   :  { %v407_v10 = vpop.f32.mrb[48].mxu0 }
 0x13d   :  { %v408_v11 = vadd.f32 %v1181_v55, %v407_v10  ;;  %v767_v12 = vpop.f32.mrb[49].mxu0 }
 0x13f   :  { %556 = vst.msk [vmem:[%s1431_s3 + $0xc0] sm:$0xff] %vm531_vm2, %v408_v11 }

</bundles_post_ra>
